<compile_context>
chip_gen: v7x
topology: tpu7x:2x2x1
jax: 0.10.0
libtpu: 0.0.40
codegen_flags: <defaults>
</compile_context>

<pallas_src>
import jax
import jax.numpy as jnp
from jax.experimental import pallas as pl
from jax.experimental.pallas import tpu as pltpu


def mlp_kernel(x_ref, w1_ref, b1_ref, w2_ref, b2_ref, w3_ref, b3_ref, o_ref):
    # x_ref / w*_ref are bf16 (folded / block-diagonal), b*_ref are f32.
    # MXU accumulates in f32; all elementwise work (bias add, ReLU) stays in f32.
    # Dropout == identity (eval mode).
    h = jnp.dot(x_ref[...], w1_ref[...], preferred_element_type=jnp.float32) + b1_ref[...]
    h = jnp.maximum(h, 0.0)
    h = jnp.dot(h.astype(jnp.bfloat16), w2_ref[...],
                preferred_element_type=jnp.float32) + b2_ref[...]
    h = jnp.maximum(h, 0.0)
    out = jnp.dot(h.astype(jnp.bfloat16), w3_ref[...],
                  preferred_element_type=jnp.float32) + b3_ref[...]
    # Output stays in the folded (rows/f, Dout*f) layout -> plain store, no relayout.
    o_ref[...] = out.astype(o_ref.dtype)


def _round_up(n, m):
    return -(-n // m) * m


def _default_fold():
    # 256x256-MXU generations (v6e / v7x) -> fold 4; 128x128 MXU (v5e and older) -> fold 2.
    try:
        kind = jax.devices()[0].device_kind.lower()
    except Exception:
        return 4
    if any(tag in kind for tag in ("v2", "v3", "v4", "v5")):
        return 2
    return 4


def mlp_pallas(x, params, *, fold=None, tile_b=None, out_dtype=None):
    """Fused 3-layer MLP forward (eval mode).

    x: (B, Din) float32.  params: [(Wi, bi)] with Wi stored as (in, out), bi as (1, out)
    (i.e. already transposed from torch's (out, in) so the kernel computes x @ W + b).
    """
    (w1, b1), (w2, b2), (w3, b3) = params
    B, Din = x.shape
    H1 = w1.shape[1]
    H2 = w2.shape[1]
    Dout = w3.shape[1]
    out_dtype = x.dtype if out_dtype is None else out_dtype

    f = _default_fold() if fold is None else fold
    # Folded tile rows must be a multiple of 16 (bf16 sublane packing), so the
    # un-folded batch tile must be a multiple of 16 * f.
    row_align = 16 * f

    if tile_b is None:
        # Up to 8192-row tiles (amortizes the ~0.35us per-step pipeline overhead,
        # VMEM stays <~10 MiB incl. double buffering), but always >= 2 grid steps
        # for B > 256 so v7x's two TensorCores both get work via "parallel".
        target = 8192
        n_tiles = max(-(-B // target), 2 if B > 256 else 1)
        tile_b = _round_up(-(-B // n_tiles), row_align)
    else:
        tile_b = _round_up(tile_b, row_align)

    b_pad = _round_up(B, tile_b)
    if b_pad != B:
        x = jnp.pad(x, ((0, b_pad - B), (0, 0)))

    # --- Fold batch rows into the lane axis (contiguous reshape, free) ------------
    # x: (B, Din) -> (B/f, Din*f); weights become block-diagonal (f repeats); biases tile.
    xf = x.reshape(b_pad // f, Din * f).astype(jnp.bfloat16)

    def block_diag(w):   # (in, out) -> (in*f, out*f), bf16 MXU input
        return jnp.kron(jnp.eye(f, dtype=w.dtype), w).astype(jnp.bfloat16)

    def tile_bias(b):    # (1, out) -> (1, out*f), f32 elementwise path
        return jnp.tile(b.astype(jnp.float32).reshape(1, -1), (1, f))

    w1f, w2f, w3f = block_diag(w1), block_diag(w2), block_diag(w3)
    b1f, b2f, b3f = tile_bias(b1), tile_bias(b2), tile_bias(b3)

    tr = tile_b // f                 # folded rows per grid step (multiple of 16)
    grid = (b_pad // tile_b,)

    def batch_map(i):
        return (i, 0)

    def rep_map(i):
        # Constant block index: weights/biases stay resident in VMEM (no re-DMA).
        return (0, 0)

    out_folded = pl.pallas_call(
        mlp_kernel,
        out_shape=jax.ShapeDtypeStruct((b_pad // f, Dout * f), out_dtype),
        grid=grid,
        in_specs=[
            pl.BlockSpec((tr, Din * f), batch_map),        # x tile (bf16, folded)
            pl.BlockSpec((Din * f, H1 * f), rep_map),      # W1 block-diag (bf16)
            pl.BlockSpec((1, H1 * f), rep_map),            # b1 (f32)
            pl.BlockSpec((H1 * f, H2 * f), rep_map),       # W2 block-diag
            pl.BlockSpec((1, H2 * f), rep_map),            # b2
            pl.BlockSpec((H2 * f, Dout * f), rep_map),     # W3 block-diag
            pl.BlockSpec((1, Dout * f), rep_map),          # b3
        ],
        out_specs=pl.BlockSpec((tr, Dout * f), batch_map),
        compiler_params=pltpu.CompilerParams(
            dimension_semantics=("parallel",),
        ),
    )(xf, w1f, b1f, w2f, b2f, w3f, b3f)

    # Undo the lane fold (contiguous reshape) and drop any batch padding.
    return out_folded.reshape(b_pad, Dout)[:B]


def init_linear(key, fan_in, fan_out, dtype=jnp.float32):
    # Deterministic init mimicking torch.nn.Linear default (uniform +/- 1/sqrt(fan_in)).
    kw, kb = jax.random.split(key)
    bound = 1.0 / (fan_in ** 0.5)
    # Stored directly as (in, out) so the kernel does x @ W + b.
    w = jax.random.uniform(kw, (fan_in, fan_out), dtype, -bound, bound)
    b = jax.random.uniform(kb, (1, fan_out), dtype, -bound, bound)
    return w, b


def mlp_reference(x, params, *, quantize_bf16=False):
    """Pure-JAX reference.  With quantize_bf16=True it mirrors the kernel's numerics
    (bf16 matmul inputs, f32 accumulation/elementwise) so only summation order differs."""
    (w1, b1), (w2, b2), (w3, b3) = params
    hp = jax.lax.Precision.HIGHEST
    q = (lambda a: a.astype(jnp.bfloat16).astype(jnp.float32)) if quantize_bf16 else (lambda a: a)
    h = jnp.maximum(jnp.dot(q(x), q(w1), precision=hp) + b1, 0.0)
    h = jnp.maximum(jnp.dot(q(h), q(w2), precision=hp) + b2, 0.0)
    return jnp.dot(q(h), q(w3), precision=hp) + b3


if __name__ == "__main__":
    mlp_units = [32, 64, 64, 16]
    batch = 16

    key = jax.random.PRNGKey(0)
    kx, k1, k2, k3 = jax.random.split(key, 4)

    x = jax.random.normal(kx, (batch, mlp_units[0]), jnp.float32)
    params = [
        init_linear(k1, mlp_units[0], mlp_units[1]),
        init_linear(k2, mlp_units[1], mlp_units[2]),
        init_linear(k3, mlp_units[2], mlp_units[3]),
    ]

    out = jax.block_until_ready(mlp_pallas(x, params))
    assert out.shape == (batch, mlp_units[-1])

    # Strict check against a reference that mirrors the kernel's bf16-input /
    # f32-accumulate numerics (block-diagonal zero blocks add exact zeros, so only
    # MXU accumulation order differs).
    ref_q = mlp_reference(x, params, quantize_bf16=True)
    assert jnp.allclose(out, ref_q, atol=1e-4, rtol=1e-4), float(jnp.max(jnp.abs(out - ref_q)))

    # Loose sanity check against the pure-f32 reference (bf16 quantization error only).
    ref_f32 = mlp_reference(x, params, quantize_bf16=False)
    assert jnp.allclose(out, ref_f32, atol=1e-1, rtol=1e-1)

    print("KERNEL_OK")
</pallas_src>

<mosaic_0001>
module attributes {stable_mosaic.version = 11 : i64} {
  func.func @mlp_kernel(%arg0: i32, %arg1: memref<16x128xbf16, #tpu.memory_space<vmem>>, %arg2: memref<128x256xbf16, #tpu.memory_space<vmem>>, %arg3: memref<1x256xf32, #tpu.memory_space<vmem>>, %arg4: memref<256x256xbf16, #tpu.memory_space<vmem>>, %arg5: memref<1x256xf32, #tpu.memory_space<vmem>>, %arg6: memref<256x64xbf16, #tpu.memory_space<vmem>>, %arg7: memref<1x64xf32, #tpu.memory_space<vmem>>, %arg8: memref<16x64xf32, #tpu.memory_space<vmem>>) attributes {dimension_semantics = [#tpu.dimension_semantics<parallel>], iteration_bounds = array<i64: 1>, scalar_prefetch = 0 : i64, scratch_operands = 0 : i64, tpu.core_type = #tpu.core_type<tc>, window_params = [{transform_indices = @transform_0, window_bounds = array<i64: 16, 128>}, {pipeline_mode = #tpu.pipeline_mode<synchronous>, transform_indices = @transform_1, window_bounds = array<i64: 128, 256>}, {pipeline_mode = #tpu.pipeline_mode<synchronous>, transform_indices = @transform_2, window_bounds = array<i64: 1, 256>}, {pipeline_mode = #tpu.pipeline_mode<synchronous>, transform_indices = @transform_3, window_bounds = array<i64: 256, 256>}, {pipeline_mode = #tpu.pipeline_mode<synchronous>, transform_indices = @transform_4, window_bounds = array<i64: 1, 256>}, {pipeline_mode = #tpu.pipeline_mode<synchronous>, transform_indices = @transform_5, window_bounds = array<i64: 256, 64>}, {pipeline_mode = #tpu.pipeline_mode<synchronous>, transform_indices = @transform_6, window_bounds = array<i64: 1, 64>}, {transform_indices = @transform_7, window_bounds = array<i64: 16, 64>}]} {
    %c0 = arith.constant 0 : index
    %c0_0 = arith.constant 0 : index
    %0 = vector.load %arg1[%c0, %c0_0] : memref<16x128xbf16, #tpu.memory_space<vmem>>, vector<16x128xbf16>
    %c0_1 = arith.constant 0 : index
    %c0_2 = arith.constant 0 : index
    %1 = vector.load %arg2[%c0_1, %c0_2] : memref<128x256xbf16, #tpu.memory_space<vmem>>, vector<128x256xbf16>
    %cst = arith.constant dense<0.000000e+00> : vector<16x256xf32>
    %2 = tpu.matmul %0, %1, %cst {dimension_numbers = #tpu.dot_dimension_numbers<[1], [0], [0], [1], [0, 0, 1, 1], [], []>} : vector<16x128xbf16>, vector<128x256xbf16>, vector<16x256xf32> -> vector<16x256xf32>
    %c0_3 = arith.constant 0 : index
    %c0_4 = arith.constant 0 : index
    %3 = vector.load %arg3[%c0_3, %c0_4] : memref<1x256xf32, #tpu.memory_space<vmem>>, vector<1x256xf32>
    %4 = vector.broadcast %3 : vector<1x256xf32> to vector<16x256xf32>
    %5 = arith.addf %2, %4 : vector<16x256xf32>
    %cst_5 = arith.constant 0.000000e+00 : f32
    %6 = vector.broadcast %cst_5 : f32 to vector<16x256xf32>
    %7 = arith.maximumf %5, %6 : vector<16x256xf32>
    %8 = arith.truncf %7 : vector<16x256xf32> to vector<16x256xbf16>
    %c0_6 = arith.constant 0 : index
    %c0_7 = arith.constant 0 : index
    %9 = vector.load %arg4[%c0_6, %c0_7] : memref<256x256xbf16, #tpu.memory_space<vmem>>, vector<256x256xbf16>
    %cst_8 = arith.constant dense<0.000000e+00> : vector<16x256xf32>
    %10 = tpu.matmul %8, %9, %cst_8 {dimension_numbers = #tpu.dot_dimension_numbers<[1], [0], [0], [1], [0, 0, 1, 1], [], []>} : vector<16x256xbf16>, vector<256x256xbf16>, vector<16x256xf32> -> vector<16x256xf32>
    %c0_9 = arith.constant 0 : index
    %c0_10 = arith.constant 0 : index
    %11 = vector.load %arg5[%c0_9, %c0_10] : memref<1x256xf32, #tpu.memory_space<vmem>>, vector<1x256xf32>
    %12 = vector.broadcast %11 : vector<1x256xf32> to vector<16x256xf32>
    %13 = arith.addf %10, %12 : vector<16x256xf32>
    %cst_11 = arith.constant 0.000000e+00 : f32
    %14 = vector.broadcast %cst_11 : f32 to vector<16x256xf32>
    %15 = arith.maximumf %13, %14 : vector<16x256xf32>
    %16 = arith.truncf %15 : vector<16x256xf32> to vector<16x256xbf16>
    %c0_12 = arith.constant 0 : index
    %c0_13 = arith.constant 0 : index
    %17 = vector.load %arg6[%c0_12, %c0_13] : memref<256x64xbf16, #tpu.memory_space<vmem>>, vector<256x64xbf16>
    %cst_14 = arith.constant dense<0.000000e+00> : vector<16x64xf32>
    %18 = tpu.matmul %16, %17, %cst_14 {dimension_numbers = #tpu.dot_dimension_numbers<[1], [0], [0], [1], [0, 0, 1, 1], [], []>} : vector<16x256xbf16>, vector<256x64xbf16>, vector<16x64xf32> -> vector<16x64xf32>
    %c0_15 = arith.constant 0 : index
    %c0_16 = arith.constant 0 : index
    %19 = vector.load %arg7[%c0_15, %c0_16] : memref<1x64xf32, #tpu.memory_space<vmem>>, vector<1x64xf32>
    %20 = vector.broadcast %19 : vector<1x64xf32> to vector<16x64xf32>
    %21 = arith.addf %18, %20 : vector<16x64xf32>
    %c0_17 = arith.constant 0 : index
    %c0_18 = arith.constant 0 : index
    %22 = vector.load %arg8[%c0_17, %c0_18] : memref<16x64xf32, #tpu.memory_space<vmem>>, vector<16x64xf32>
    tpu.vector_store %arg8[%c0_17, %c0_18], %21 {strides = array<i32>} : memref<16x64xf32, #tpu.memory_space<vmem>>, vector<16x64xf32>,
    return
  }
  func.func @transform_0(%arg0: i32) -> (i32, i32) {
    %c0_i32 = arith.constant 0 : i32
    %c0_i32_0 = arith.constant 0 : i32
    return %arg0, %c0_i32 : i32, i32
  }
  func.func @transform_1(%arg0: i32) -> (i32, i32) {
    %c0_i32 = arith.constant 0 : i32
    %c0_i32_0 = arith.constant 0 : i32
    %c0_i32_1 = arith.constant 0 : i32
    return %c0_i32, %c0_i32_0 : i32, i32
  }
  func.func @transform_2(%arg0: i32) -> (i32, i32) {
    %c0_i32 = arith.constant 0 : i32
    %c0_i32_0 = arith.constant 0 : i32
    %c0_i32_1 = arith.constant 0 : i32
    return %c0_i32, %c0_i32_0 : i32, i32
  }
  func.func @transform_3(%arg0: i32) -> (i32, i32) {
    %c0_i32 = arith.constant 0 : i32
    %c0_i32_0 = arith.constant 0 : i32
    %c0_i32_1 = arith.constant 0 : i32
    return %c0_i32, %c0_i32_0 : i32, i32
  }
  func.func @transform_4(%arg0: i32) -> (i32, i32) {
    %c0_i32 = arith.constant 0 : i32
    %c0_i32_0 = arith.constant 0 : i32
    %c0_i32_1 = arith.constant 0 : i32
    return %c0_i32, %c0_i32_0 : i32, i32
  }
  func.func @transform_5(%arg0: i32) -> (i32, i32) {
    %c0_i32 = arith.constant 0 : i32
    %c0_i32_0 = arith.constant 0 : i32
    %c0_i32_1 = arith.constant 0 : i32
    return %c0_i32, %c0_i32_0 : i32, i32
  }
  func.func @transform_6(%arg0: i32) -> (i32, i32) {
    %c0_i32 = arith.constant 0 : i32
    %c0_i32_0 = arith.constant 0 : i32
    %c0_i32_1 = arith.constant 0 : i32
    return %c0_i32, %c0_i32_0 : i32, i32
  }
  func.func @transform_7(%arg0: i32) -> (i32, i32) {
    %c0_i32 = arith.constant 0 : i32
    %c0_i32_0 = arith.constant 0 : i32
    return %arg0, %c0_i32 : i32, i32
  }
}

</mosaic_0001>

<bundles_post_ra>
// kernel: tpu_custom_call.1
= control target key start
LH: loop header
LB: loop body
LE: loop exit
PB: predicated region body
PF: predicated region fallthrough
CT: control target
= control target key end

     0   :  { %12 = vsyncpa [#allocation3], 0  ;;  %s1069_s0 = inlined_call_operand.vmem [shape: bf16[16,128], index: 0, kind: input, shape index: {}]   ;;  %s1070_s1 = inlined_call_operand.vmem [shape: bf16[128,256], index: 1, kind: input, shape index: {}]   ;;  %s1071_s2 = inlined_call_operand.vmem [shape: f32[1,256], index: 2, kind: input, shape index: {}]   ;;  %s1072_s3 = inlined_call_operand.hbm [shape: bf16[256,256], index: 3, kind: input, shape index: {}]   ;;  %s1073_s4 = inlined_call_operand.vmem [shape: f32[1,256], index: 4, kind: input, shape index: {}]   ;;  %s1074_s5 = inlined_call_operand.vmem [shape: bf16[256,64], index: 5, kind: input, shape index: {}]   ;;  %s1075_s6 = inlined_call_operand.vmem [shape: f32[1,64], index: 6, kind: input, shape index: {}]   ;;  %s1076_s7 = inlined_call_operand.hbm [shape: f32[16,64], index: 7, kind: output, shape index: {}]  }
   0x1   :  { %13 = vsyncpa [#allocation4], 0  ;;  %s886_s24 = smov [#allocation2]   ;;  %s838_s28 = scalar_lea.hbm %s1072_s3, 4096 }
   0x2   :  { %s25_s25 = sshll.u32 %s886_s24, 4  ;;  %p839_p0 = scmp.ne.s32.totalorder %s1072_s3, %s838_s28  ;;  %s26_s25 = int_to_ptr.vmem [resolvable:$true] %s25_s25 }
   0x3   :  { %p842_p1 = scmp.lt.u32.totalorder %s838_s28, %s1072_s3 }
   0x5   :  { %p844_p2 = pnand %p842_p1, %p839_p0 }
   0x7   :  { %847 = shalt.err (!%p844_p2)
}
   0x8   :  { %s848_s10 = scalar_lea.vmem %s26_s25, 4096  ;;  %p853_p4 = scmp.lt.s32.totalorder %s26_s25, %s26_s25 }
   0x9   :  { %p849_p3 = scmp.ne.s32.totalorder %s26_s25, %s848_s10  ;;  %p854_p5 = scmp.lt.s32.totalorder %s848_s10, %s848_s10 }
   0xb   :  { %p855_p6 = por %p854_p5, %p853_p4 }
   0xd   :  { %p856_p7 = pnand %p855_p6, %p849_p3 }
   0xf   :  { %859 = shalt.err (!%p856_p7)
}
  0x10   :  { %s887_s11 = smov 128   ;;  %s888_s12 = smov 8  }
  0x11   :  { %31 = dma.hbm_to_vmem [thread:$0]  %s1072_s3, 4096, %s26_s25, [#allocation3], %s887_s11, %s887_s11, %s888_s12  }
  0x12   :  { %882 = dma.done.wait [#allocation3], 4096  }
  0x13   :  { %883 = vsyncadd [#allocation3], 4294963200  ;;  %v889_v0 = vmov 0   ;;  %v749_v1 = vld [vmem:[%s1070_s1 + $0x4] ss:$8 sps:$4 sm:$0xff]   ;;  %v826_v54 = vld [vmem:[%s1074_s5 + $0x50] sm:$0xff]   ;;  %v62_v61 = vlaneseq }
  0x14   :  { %190 = vmatprep.mubr.bf16.mxu0 %v889_v0  ;;  %v751_v2 = vld [vmem:[%s1070_s1] ss:$8 sps:$4 sm:$0xff]   ;;  %158 = vmatprep.subr.bf16.mxu0 %v749_v1  ;;  %v752_v3 = vld [vmem:[%s1070_s1 + $0x14] ss:$8 sps:$4 sm:$0xff]   ;;  %v754_v4 = vld [vmem:[%s1070_s1 + $0x10] ss:$8 sps:$4 sm:$0xff]  }
  0x15   :  { %159 = vmatpush1.bf16.msra.mxu0 %v751_v2  ;;  %v755_v5 = vld [vmem:[%s1070_s1 + $0x24] ss:$8 sps:$4 sm:$0xff]   ;;  %v757_v6 = vld [vmem:[%s1070_s1 + $0x20] ss:$8 sps:$4 sm:$0xff]   ;;  %v758_v7 = vld [vmem:[%s1070_s1 + $0x34] ss:$8 sps:$4 sm:$0xff]  }
  0x16   :  { %160 = vmatprep.subr.bf16.mxu0 %v752_v3  ;;  %v760_v8 = vld [vmem:[%s1070_s1 + $0x30] ss:$8 sps:$4 sm:$0xff]   ;;  %v761_v9 = vld [vmem:[%s1070_s1 + $0x44] ss:$8 sps:$4 sm:$0xff]   ;;  %v776_v11 = vld [vmem:[#allocation2] ss:$8 sps:$4 sm:$0xff]  }
  0x17   :  { %v774_v10 = vld [vmem:[#allocation2 + $0x4] ss:$8 sps:$4 sm:$0xff]   ;;  %v777_v12 = vld [vmem:[#allocation2 + $0x14] ss:$8 sps:$4 sm:$0xff]   ;;  %v763_v13 = vld [vmem:[%s1070_s1 + $0x40] ss:$8 sps:$4 sm:$0xff]  }
  0x18   :  { %411 = vmatprep.subr.bf16.mxu1 %v774_v10  ;;  %v779_v14 = vld [vmem:[#allocation2 + $0x10] ss:$8 sps:$4 sm:$0xff]   ;;  %v764_v15 = vld [vmem:[%s1070_s1 + $0x54] ss:$8 sps:$4 sm:$0xff]   ;;  %v780_v16 = vld [vmem:[#allocation2 + $0x24] ss:$8 sps:$4 sm:$0xff]  }
  0x19   :  { %161 = vmatpush1.bf16.msra.mxu0 %v754_v4  ;;  %412 = vmatpush1.bf16.msra.mxu1 %v776_v11  ;;  %v766_v17 = vld [vmem:[%s1070_s1 + $0x50] ss:$8 sps:$4 sm:$0xff]   ;;  %v782_v18 = vld [vmem:[#allocation2 + $0x20] ss:$8 sps:$4 sm:$0xff]   ;;  %v767_v19 = vld [vmem:[%s1070_s1 + $0x64] ss:$8 sps:$4 sm:$0xff]  }
  0x1a   :  { %162 = vmatprep.subr.bf16.mxu0 %v755_v5  ;;  %413 = vmatprep.subr.bf16.mxu1 %v777_v12  ;;  %v783_v20 = vld [vmem:[#allocation2 + $0x34] ss:$8 sps:$4 sm:$0xff]   ;;  %v769_v21 = vld [vmem:[%s1070_s1 + $0x60] ss:$8 sps:$4 sm:$0xff]   ;;  %v785_v22 = vld [vmem:[#allocation2 + $0x30] ss:$8 sps:$4 sm:$0xff]  }
  0x1b   :  { %v770_v23 = vld [vmem:[%s1070_s1 + $0x74] ss:$8 sps:$4 sm:$0xff]   ;;  %v786_v24 = vld [vmem:[#allocation2 + $0x44] ss:$8 sps:$4 sm:$0xff]   ;;  %v772_v25 = vld [vmem:[%s1070_s1 + $0x70] ss:$8 sps:$4 sm:$0xff]  }
  0x1c   :  { %v788_v26 = vld [vmem:[#allocation2 + $0x40] ss:$8 sps:$4 sm:$0xff]   ;;  %v789_v28 = vld [vmem:[#allocation2 + $0x54] ss:$8 sps:$4 sm:$0xff]   ;;  %v791_v29 = vld [vmem:[#allocation2 + $0x50] ss:$8 sps:$4 sm:$0xff]  }
  0x1d   :  { %163 = vmatpush1.bf16.msra.mxu0 %v757_v6  ;;  %414 = vmatpush1.bf16.msra.mxu1 %v779_v14  ;;  %v773_v27 = vld [vmem:[%s1069_s0] sm:$0xff]   ;;  %v795_v32 = vld [vmem:[#allocation2 + $0x74] ss:$8 sps:$4 sm:$0xff]   ;;  %v797_v33 = vld [vmem:[#allocation2 + $0x70] ss:$8 sps:$4 sm:$0xff]   ;;  %v63_v62 = vshrl.u32 %v62_v61, 7 }
  0x1e   :  { %164 = vmatprep.subr.bf16.mxu0 %v758_v7  ;;  %415 = vmatprep.subr.bf16.mxu1 %v780_v16  ;;  %v792_v30 = vld [vmem:[#allocation2 + $0x64] ss:$8 sps:$4 sm:$0xff]   ;;  %v794_v31 = vld [vmem:[#allocation2 + $0x60] ss:$8 sps:$4 sm:$0xff]   ;;  %v801_v36 = vld [vmem:[#allocation2 + $0x94] ss:$8 sps:$4 sm:$0xff]  }
  0x1f   :  { %v798_v34 = vld [vmem:[#allocation2 + $0x84] ss:$8 sps:$4 sm:$0xff]   ;;  %v800_v35 = vld [vmem:[#allocation2 + $0x80] ss:$8 sps:$4 sm:$0xff]   ;;  %v803_v37 = vld [vmem:[#allocation2 + $0x90] ss:$8 sps:$4 sm:$0xff]  }
  0x20   :  { %v804_v38 = vld [vmem:[#allocation2 + $0xa4] ss:$8 sps:$4 sm:$0xff]   ;;  %v806_v39 = vld [vmem:[#allocation2 + $0xa0] ss:$8 sps:$4 sm:$0xff]   ;;  %v807_v40 = vld [vmem:[#allocation2 + $0xb4] ss:$8 sps:$4 sm:$0xff]  }
  0x21   :  { %165 = vmatpush1.bf16.msra.mxu0 %v760_v8  ;;  %416 = vmatpush1.bf16.msra.mxu1 %v782_v18  ;;  %v809_v41 = vld [vmem:[#allocation2 + $0xb0] ss:$8 sps:$4 sm:$0xff]   ;;  %v810_v42 = vld [vmem:[#allocation2 + $0xc4] ss:$8 sps:$4 sm:$0xff]   ;;  %v812_v43 = vld [vmem:[#allocation2 + $0xc0] ss:$8 sps:$4 sm:$0xff]  }
  0x22   :  { %166 = vmatprep.subr.bf16.mxu0 %v761_v9  ;;  %417 = vmatprep.subr.bf16.mxu1 %v783_v20  ;;  %v813_v44 = vld [vmem:[#allocation2 + $0xd4] ss:$8 sps:$4 sm:$0xff]   ;;  %v815_v45 = vld [vmem:[#allocation2 + $0xd0] ss:$8 sps:$4 sm:$0xff]   ;;  %v816_v46 = vld [vmem:[#allocation2 + $0xe4] ss:$8 sps:$4 sm:$0xff]  }
  0x23   :  { %v818_v47 = vld [vmem:[#allocation2 + $0xe0] ss:$8 sps:$4 sm:$0xff]   ;;  %v819_v48 = vld [vmem:[#allocation2 + $0xf4] ss:$8 sps:$4 sm:$0xff]   ;;  %v821_v49 = vld [vmem:[#allocation2 + $0xf0] ss:$8 sps:$4 sm:$0xff]  }
  0x24   :  { %v822_v50 = vld [vmem:[%s1074_s5 + $0x40] sm:$0xff]   ;;  %v824_v52 = vld [vmem:[%s1074_s5 + $0x48] sm:$0xff]   ;;  %v827_v55 = vld [vmem:[%s1074_s5 + $0x10] sm:$0xff]   ;;  %v64_v63 = vsub.s32 0, %v63_v62  ;;  %v68_v1 = vsub.s32 1, %v63_v62  ;;  %vm636_vm0 = vcmask 523264  }
  0x25   :  { %167 = vmatpush1.bf16.msra.mxu0 %v763_v13  ;;  %418 = vmatpush1.bf16.msra.mxu1 %v785_v22  ;;  %v823_v51 = vld [vmem:[%s1074_s5] sm:$0xff]   ;;  %v825_v53 = vld [vmem:[%s1074_s5 + $0x8] sm:$0xff]   ;;  %v828_v56 = vld [vmem:[%s1074_s5 + $0x58] sm:$0xff]   ;;  %s890_s14 = smov [#allocation5]  }
  0x26   :  { %168 = vmatprep.subr.bf16.mxu0 %v764_v15  ;;  %419 = vmatprep.subr.bf16.mxu1 %v786_v24  ;;  %v829_v57 = vld [vmem:[%s1074_s5 + $0x18] sm:$0xff]   ;;  %v830_v58 = vld [vmem:[%s1074_s5 + $0x60] sm:$0xff]   ;;  %v832_v60 = vld [vmem:[%s1074_s5 + $0x68] sm:$0xff]   ;;  %s644_s15 = sshll.u32 %s890_s14, 4  ;;  %s645_s15 = int_to_ptr.vmem [resolvable:$true] %s644_s15 }
  0x27   :  { %v831_v59 = vld [vmem:[%s1074_s5 + $0x20] sm:$0xff]   ;;  %v833_v18 = vld [vmem:[%s1074_s5 + $0x28] sm:$0xff]   ;;  %v835_v20 = vld [vmem:[%s1074_s5 + $0x30] sm:$0xff]   ;;  %s860_s16 = scalar_lea.vmem %s645_s15, 256  ;;  %p865_p9 = scmp.lt.s32.totalorder %s645_s15, %s645_s15 }
  0x28   :  { %v60_v0 = vld [vmem:[%s1071_s2] sm:$0x3]  ;;  %v837_v22 = vld [vmem:[%s1074_s5 + $0x38] sm:$0xff]   ;;  %p861_p8 = scmp.ne.s32.totalorder %s645_s15, %s860_s16  ;;  %p866_p10 = scmp.lt.s32.totalorder %s860_s16, %s860_s16 }
  0x29   :  { %169 = vmatpush1.bf16.msra.mxu0 %v766_v17  ;;  %420 = vmatpush1.bf16.msra.mxu1 %v788_v26  ;;  %v65_v2 = vrot.slane %v60_v0, %v64_v63  ;;  %v69_v3 = vrot.slane %v60_v0, %v68_v1 }
  0x2a   :  { %170 = vmatprep.subr.bf16.mxu0 %v767_v19  ;;  %421 = vmatprep.subr.bf16.mxu1 %v789_v28  ;;  %v834_v19 = vld [vmem:[%s1074_s5 + $0x70] sm:$0xff]   ;;  %p867_p11 = por %p866_p10, %p865_p9 }
  0x2c   :  { %p868_p12 = pnand %p867_p11, %p861_p8 }
  0x2d   :  { %171 = vmatpush1.bf16.msra.mxu0 %v769_v21  ;;  %422 = vmatpush1.bf16.msra.mxu1 %v791_v29  ;;  %v836_v21 = vld [vmem:[%s1074_s5 + $0x78] sm:$0xff]  }
  0x2e   :  { %172 = vmatprep.subr.bf16.mxu0 %v770_v23  ;;  %423 = vmatprep.subr.bf16.mxu1 %v792_v30  ;;  %v239_v23 = vld [vmem:[%s1073_s4] sm:$0x3] }
  0x2f   :  { %v244_v24 = vrot.slane %v239_v23, %v64_v63 }
  0x31   :  { %173 = vmatpush1.bf16.msra.mxu0 %v772_v25  ;;  %424 = vmatpush1.bf16.msra.mxu1 %v794_v31  ;;  %v248_v25 = vrot.slane %v239_v23, %v68_v1 }
  0x32   :  { %425 = vmatprep.subr.bf16.mxu1 %v795_v32  ;;  %722 = vmatprep.subr.bf16.mxu0 %v822_v50 }
  0x34   :  { %191 = vmatmul.mubr.bf16.vlgmr.msra.gmra.mrb[0].mxu0 %v773_v27 }
  0x35   :  { %426 = vmatpush1.bf16.msra.mxu1 %v797_v33  ;;  %723 = vmatpush3.bf16.msra.mxu0 %v823_v51 }
  0x36   :  { %427 = vmatprep.subr.bf16.mxu1 %v798_v34  ;;  %724 = vmatprep.subr.bf16.mxu0 %v824_v52 }
  0x39   :  { %428 = vmatpush1.bf16.msra.mxu1 %v800_v35  ;;  %725 = vmatpush3.bf16.msra.mxu0 %v825_v53 }
  0x3a   :  { %429 = vmatprep.subr.bf16.mxu1 %v801_v36  ;;  %726 = vmatprep.subr.bf16.mxu0 %v826_v54 }
  0x3d   :  { %430 = vmatpush1.bf16.msra.mxu1 %v803_v37  ;;  %727 = vmatpush3.bf16.msra.mxu0 %v827_v55 }
  0x3e   :  { %431 = vmatprep.subr.bf16.mxu1 %v804_v38  ;;  %728 = vmatprep.subr.bf16.mxu0 %v828_v56 }
  0x41   :  { %432 = vmatpush1.bf16.msra.mxu1 %v806_v39  ;;  %729 = vmatpush3.bf16.msra.mxu0 %v829_v57 }
  0x42   :  { %433 = vmatprep.subr.bf16.mxu1 %v807_v40  ;;  %730 = vmatprep.subr.bf16.mxu0 %v830_v58 }
  0x45   :  { %434 = vmatpush1.bf16.msra.mxu1 %v809_v41  ;;  %731 = vmatpush3.bf16.msra.mxu0 %v831_v59  ;;  %v705_v41 = vld [vmem:[%s1075_s6] ss:$0 sm:$0xff] }
  0x46   :  { %435 = vmatprep.subr.bf16.mxu1 %v810_v42  ;;  %732 = vmatprep.subr.bf16.mxu0 %v832_v60 }
  0x49   :  { %436 = vmatpush1.bf16.msra.mxu1 %v812_v43  ;;  %733 = vmatpush3.bf16.msra.mxu0 %v833_v18 }
  0x4a   :  { %437 = vmatprep.subr.bf16.mxu1 %v813_v44  ;;  %734 = vmatprep.subr.bf16.mxu0 %v834_v19 }
  0x4d   :  { %438 = vmatpush1.bf16.msra.mxu1 %v815_v45  ;;  %735 = vmatpush3.bf16.msra.mxu0 %v835_v20 }
  0x4e   :  { %439 = vmatprep.subr.bf16.mxu1 %v816_v46  ;;  %736 = vmatprep.subr.bf16.mxu0 %v836_v21 }
  0x51   :  { %440 = vmatpush1.bf16.msra.mxu1 %v818_v47  ;;  %737 = vmatpush3.bf16.msra.mxu0 %v837_v22 }
  0x52   :  { %441 = vmatprep.subr.bf16.mxu1 %v819_v48 }
  0x55   :  { %442 = vmatpush1.bf16.msra.mxu1 %v821_v49 }
 0x107   :  { %v192_v4 = vpop.f32.mrb[0].mxu0 }
 0x108   :  { %v193_v5 = vadd.f32 %v192_v4, %v65_v2  ;;  %v194_v6 = vpop.f32.mrb[1].mxu0 }
 0x109   :  { %v195_v7 = vadd.f32 %v194_v6, %v69_v3  ;;  %v196_v8 = vpop.f32.mrb[2].mxu0 }
 0x10a   :  { %v197_v9 = vadd.f32 %v196_v8, %v65_v2  ;;  %v198_v10 = vpop.f32.mrb[3].mxu0  ;;  %v201_v12 = vmax.f32 %v193_v5, 0.0 }
 0x10b   :  { %v199_v11 = vadd.f32 %v198_v10, %v69_v3  ;;  %v202_v14 = vmax.f32 %v195_v7, 0.0 }
 0x10c   :  { %v203_v13 = vmax.f32 %v197_v9, 0.0 }
 0x10d   :  { %v204_v15 = vmax.f32 %v199_v11, 0.0 }
 0x10e   :  { %v205_v16 = vpack.c.bf16 %v203_v13, %v201_v12 }
 0x10f   :  { %v206_v17 = vpack.c.bf16 %v204_v15, %v202_v14 }
 0x111   :  { %443 = vmatprep.mubr.bf16.mxu1 %v206_v17 }
 0x112   :  { %444 = vmatmul.mubr.bf16.vlgmr.msra.gmra.mrb[0].mxu1 %v205_v16 }
 0x1e5   :  { %v445_v26 = vpop.f32.mrb[0].mxu1 }
 0x1e6   :  { %v446_v27 = vadd.f32 %v445_v26, %v244_v24  ;;  %v447_v28 = vpop.f32.mrb[1].mxu1 }
 0x1e7   :  { %v448_v29 = vadd.f32 %v447_v28, %v248_v25  ;;  %v449_v30 = vpop.f32.mrb[2].mxu1 }
 0x1e8   :  { %v450_v31 = vadd.f32 %v449_v30, %v244_v24  ;;  %v451_v32 = vpop.f32.mrb[3].mxu1  ;;  %v454_v34 = vmax.f32 %v446_v27, 0.0 }
 0x1e9   :  { %v452_v33 = vadd.f32 %v451_v32, %v248_v25  ;;  %v455_v36 = vmax.f32 %v448_v29, 0.0 }
 0x1ea   :  { %v456_v35 = vmax.f32 %v450_v31, 0.0 }
 0x1eb   :  { %v457_v37 = vmax.f32 %v452_v33, 0.0 }
 0x1ec   :  { %v458_v38 = vpack.c.bf16 %v456_v35, %v454_v34 }
 0x1ed   :  { %v459_v39 = vpack.c.bf16 %v457_v37, %v455_v36 }
 0x1ef   :  { %627 = vmatprep.mubr.bf16.mxu0 %v459_v39 }
 0x1f0   :  { %628 = vmatmul.mubr.bf16.vlgmr.msra.gmra.mrb[4].mxu0 %v458_v38 }
 0x2c3   :  { %v738_v40 = vpop.f32.mrb[4].mxu0 }
 0x2c4   :  { %v739_v42 = vpop.f32.mrb[5].mxu0 }
 0x2c5   :  { %v740_v43 = vadd.f32 %v739_v42, %v738_v40  ;;  %v741_v44 = vpop.f32.mrb[6].mxu0 }
 0x2c6   :  { %v742_v45 = vpop.f32.mrb[7].mxu0 }
 0x2c7   :  { %v630_v46 = vadd.f32 %v740_v43, %v705_v41  ;;  %v743_v47 = vadd.f32 %v742_v45, %v741_v44 }
 0x2c9   :  { %v633_v48 = vadd.f32 %v743_v47, %v705_v41  ;;  %637 = vst.msk [vmem:[#allocation5] sm:$0xff] %vm636_vm0, %v630_v46 }
 0x2cb   :  { %638 = vst.msk [vmem:[#allocation5 + $0x8] sm:$0xff] %vm636_vm0, %v633_v48 }
 0x2cc   :  { %871 = shalt.err (!%p868_p12)
}
 0x2cd   :  { %s872_s18 = scalar_lea.hbm %s1076_s7, 256 }
 0x2ce   :  { %p873_p13 = scmp.ne.s32.totalorder %s1076_s7, %s872_s18  ;;  %p876_p0 = scmp.lt.u32.totalorder %s872_s18, %s1076_s7 }
 0x2d0   :  { %p878_p1 = pnand %p876_p0, %p873_p13 }
 0x2d2   :  { %881 = shalt.err (!%p878_p1)
}
 0x2d3   :  { %650 = dma.vmem_to_hbm [thread:$0]  %s645_s15, 256, %s1076_s7, [#allocation4], %s887_s11, %s887_s11, %s888_s12  }
 0x2d4   :  { %884 = dma.done.wait [#allocation4], 256  }
 0x2d5   :  { %885 = vsyncadd [#allocation4], 4294967040 }
 0x2d6   :  { %654 = vsyncpa [#allocation3], 1 }
 0x2d7   :  { %655 = vsyncpa [#allocation4], 1 }

</bundles_post_ra>
